<compile_context>
chip_gen: v7x
topology: tpu7x:2x2x1
jax: 0.10.0
libtpu: 0.0.40
codegen_flags: <defaults>
</compile_context>

<pallas_src>
import jax
import jax.numpy as jnp
from jax import lax
from jax.experimental import pallas as pl
from jax.experimental.pallas import tpu as pltpu


def _rmsnorm_kernel(x_ref, g_ref, o_ref):
    # x_ref: (tm, d) tile of rows; g_ref: (1, d) pre-added gain (f32);
    # o_ref: (tm, d) output.
    # Sum-of-squares from a fresh cast -- don't keep the f32 copy of the tile
    # live across the reduce (saves VMEM for sub-32-bit inputs).
    xf = x_ref[...].astype(jnp.float32)
    ms = jnp.mean(xf * xf, axis=-1, keepdims=True) + 1e-6   # XLU lane reduce
    inv = lax.rsqrt(ms)                                      # EUP
    # Re-load + re-cast the source tile for the output expression; the cast is
    # free VPU filler in a mem-bound kernel and keeps only the (narrow) source
    # block live instead of its f32 copy.
    o_ref[...] = (x_ref[...].astype(jnp.float32) * inv * g_ref[...]).astype(
        o_ref.dtype)


def _device_defaults(itemsize):
    """(target_block_bytes, min_grid_steps) per TPU generation."""
    try:
        kind = jax.devices()[0].device_kind.lower()
    except Exception:
        kind = ""
    if "v7" in kind or "tpu7" in kind:
        # 3.2 TB/s HBM, 64 MiB physical VMEM, 2 TensorCores: bigger blocks to
        # amortize the ~0.35us/step overhead, and >= 4 steps per TC so the
        # pipeline overlaps at all (2 steps == one per core == zero overlap).
        return 4 << 20, 8
    if "v6" in kind:
        # ~1.4 TB/s HBM, 32 MiB default scoped VMEM, 1 TC.
        return 2 << 20, 3
    # v5e (or unknown): ~820 GB/s HBM, 16 MiB default scoped VMEM, 1 TC.
    # 1 MiB blocks are still ~2.5us of traffic (overhead well amortized) and
    # leave headroom for the f32 intermediates when the input is sub-32-bit.
    return ((2 << 20) if itemsize >= 4 else (1 << 20)), 3


def _choose_tm(rows, d, itemsize, *, target_block_bytes, min_steps):
    """Row-tile size: ~target_block_bytes per x block, sublane-aligned, and
    leaving >= min_steps grid steps so the pipeline reaches steady state."""
    # sublane pack factor: f32 -> 8, bf16 -> 16, int8/fp8 -> 32
    pack = 8 * max(1, 4 // int(itemsize))
    if rows <= pack:
        return int(rows)   # single full-extent block
    tm = max(pack, target_block_bytes // max(1, d * int(itemsize)))
    if rows >= min_steps * pack:
        tm = min(tm, pl.cdiv(rows, min_steps))
    tm = min(tm, rows)
    tm = max(pack, (tm // pack) * pack)
    return int(tm)


def _vmem_limit_bytes(tm, d, itemsize):
    """Explicit scoped-VMEM budget: double-buffered I/O blocks + f32 temps."""
    io_block = tm * d * int(itemsize)
    f32_tile = tm * d * 4
    need = 2 * (io_block + io_block) + 2 * f32_tile + d * 4 + (2 << 20)
    # Floor at the common default, cap safely under v7x's 64 MiB physical.
    return int(min(max(need, 16 << 20), 48 << 20))


def rmsnorm(x, gain):
    """x: (b, h, n, d); gain: (d,).
    Returns x * rsqrt(mean(x^2, -1) + 1e-6) * (1 + gain)."""
    b, h, n, d = x.shape
    rows = b * h * n
    x2 = x.reshape(rows, d)
    # Fold the `1 + gain` add (and the cast to f32 compute dtype) into the
    # wrapper: a one-time (d,)-element op, genuinely free.
    g2 = (1.0 + gain.astype(jnp.float32)).reshape(1, d)

    itemsize = int(jnp.dtype(x.dtype).itemsize)
    target_block_bytes, min_steps = _device_defaults(itemsize)
    tm = _choose_tm(rows, d, itemsize,
                    target_block_bytes=target_block_bytes, min_steps=min_steps)
    grid = pl.cdiv(rows, tm)
    vmem_limit = _vmem_limit_bytes(tm, d, itemsize)

    out = pl.pallas_call(
        _rmsnorm_kernel,
        out_shape=jax.ShapeDtypeStruct((rows, d), x.dtype),
        grid_spec=pltpu.PrefetchScalarGridSpec(
            num_scalar_prefetch=0,
            grid=(grid,),
            in_specs=[
                pl.BlockSpec((tm, d), lambda i: (i, 0)),
                pl.BlockSpec((1, d), lambda i: (0, 0)),
            ],
            out_specs=pl.BlockSpec((tm, d), lambda i: (i, 0)),
        ),
        compiler_params=pltpu.CompilerParams(
            dimension_semantics=("parallel",),
            vmem_limit_bytes=vmem_limit,
        ),
    )(x2, g2)
    return out.reshape(b, h, n, d)


def rmsnorm_ref(x, gain):
    g = 1.0 + gain[None, None, None, :]
    rms = lax.rsqrt(
        jnp.mean(x.astype(jnp.float32) ** 2, axis=-1, keepdims=True) + 1e-6
    ).astype(x.dtype)
    return x * rms * g


if __name__ == "__main__":
    key = jax.random.PRNGKey(0)
    kx, kg = jax.random.split(key)

    b, h, n, d = 2, 4, 8, 128
    x = jax.random.normal(kx, (b, h, n, d), dtype=jnp.float32)
    # nn.Parameter(torch.randn(dim) * 0.02) — deterministic synthetic init.
    gain = jax.random.normal(kg, (d,), dtype=jnp.float32) * 0.02

    out = jax.block_until_ready(rmsnorm(x, gain))

    ref = rmsnorm_ref(x, gain)
    assert out.shape == (b, h, n, d)
    assert jnp.allclose(out, ref, atol=1e-5, rtol=1e-5)
    print("KERNEL_OK")
</pallas_src>

<mosaic_0001>
module attributes {stable_mosaic.version = 11 : i64} {
  func.func @_rmsnorm_kernel(%arg0: i32, %arg1: memref<16x128xf32, #tpu.memory_space<vmem>>, %arg2: memref<1x128xf32, #tpu.memory_space<vmem>>, %arg3: memref<16x128xf32, #tpu.memory_space<vmem>>) attributes {dimension_semantics = [#tpu.dimension_semantics<parallel>], iteration_bounds = array<i64: 4>, scalar_prefetch = 0 : i64, scratch_operands = 0 : i64, tpu.core_type = #tpu.core_type<tc>, window_params = [{transform_indices = @transform_0, window_bounds = array<i64: 16, 128>}, {pipeline_mode = #tpu.pipeline_mode<synchronous>, transform_indices = @transform_1, window_bounds = array<i64: 1, 128>}, {transform_indices = @transform_2, window_bounds = array<i64: 16, 128>}]} {
    %c0 = arith.constant 0 : index
    %c0_0 = arith.constant 0 : index
    %0 = vector.load %arg1[%c0, %c0_0] : memref<16x128xf32, #tpu.memory_space<vmem>>, vector<16x128xf32>
    %1 = arith.mulf %0, %0 : vector<16x128xf32>
    %cst = arith.constant dense<0.000000e+00> : vector<16xf32>
    %2 = vector.multi_reduction <add>, %1, %cst [1] : vector<16x128xf32> to vector<16xf32>
    %3 = vector.shape_cast %2 : vector<16xf32> to vector<16x1xf32>
    %cst_1 = arith.constant 1.280000e+02 : f32
    %4 = vector.broadcast %cst_1 : f32 to vector<16x1xf32>
    %5 = arith.divf %3, %4 : vector<16x1xf32>
    %cst_2 = arith.constant 9.99999997E-7 : f32
    %6 = vector.broadcast %cst_2 : f32 to vector<16x1xf32>
    %7 = arith.addf %5, %6 : vector<16x1xf32>
    %8 = math.rsqrt %7 : vector<16x1xf32>
    %c0_3 = arith.constant 0 : index
    %c0_4 = arith.constant 0 : index
    %9 = vector.load %arg1[%c0_3, %c0_4] : memref<16x128xf32, #tpu.memory_space<vmem>>, vector<16x128xf32>
    %10 = vector.broadcast %8 : vector<16x1xf32> to vector<16x128xf32>
    %11 = arith.mulf %9, %10 : vector<16x128xf32>
    %c0_5 = arith.constant 0 : index
    %c0_6 = arith.constant 0 : index
    %12 = vector.load %arg2[%c0_5, %c0_6] : memref<1x128xf32, #tpu.memory_space<vmem>>, vector<1x128xf32>
    %13 = vector.broadcast %12 : vector<1x128xf32> to vector<16x128xf32>
    %14 = arith.mulf %11, %13 : vector<16x128xf32>
    %c0_7 = arith.constant 0 : index
    %c0_8 = arith.constant 0 : index
    %15 = vector.load %arg3[%c0_7, %c0_8] : memref<16x128xf32, #tpu.memory_space<vmem>>, vector<16x128xf32>
    tpu.vector_store %arg3[%c0_7, %c0_8], %14 {strides = array<i32>} : memref<16x128xf32, #tpu.memory_space<vmem>>, vector<16x128xf32>,
    return
  }
  func.func @transform_0(%arg0: i32) -> (i32, i32) {
    %c0_i32 = arith.constant 0 : i32
    %c0_i32_0 = arith.constant 0 : i32
    return %arg0, %c0_i32 : i32, i32
  }
  func.func @transform_1(%arg0: i32) -> (i32, i32) {
    %c0_i32 = arith.constant 0 : i32
    %c0_i32_0 = arith.constant 0 : i32
    %c0_i32_1 = arith.constant 0 : i32
    return %c0_i32, %c0_i32_0 : i32, i32
  }
  func.func @transform_2(%arg0: i32) -> (i32, i32) {
    %c0_i32 = arith.constant 0 : i32
    %c0_i32_0 = arith.constant 0 : i32
    return %arg0, %c0_i32 : i32, i32
  }
}

</mosaic_0001>

<bundles_post_ra>
// kernel: tpu_custom_call.1
= control target key start
LH: loop header
LB: loop body
LE: loop exit
PB: predicated region body
PF: predicated region fallthrough
CT: control target
= control target key end

     0   :  { %7 = vsyncpa [#allocation3], 0  ;;  %s632_s0 = inlined_call_operand.hbm [shape: f32[64,128], index: 0, kind: input, shape index: {}]   ;;  %s633_s1 = inlined_call_operand.vmem [shape: f32[1,128], index: 1, kind: input, shape index: {}]   ;;  %s634_s2 = inlined_call_operand.hbm [shape: f32[64,128], index: 2, kind: output, shape index: {}]  }
   0x1   :  { %9 = vsyncpa [#allocation3 + $0x1], 0 }
   0x2   :  { %10 = vsyncpa [#allocation4], 0 }
   0x3   :  { %12 = vsyncpa [#allocation4 + $0x1], 0  ;;  %s469_s9 = smov 0   ;;  %s471_s10 = smov 0  }
   0x4   :  { %s473_s11 = smov 0   ;;  %s475_s12 = smov 0  }
   0x5 LB: > { %s490_s13 = sadd.s32 4294967295, %s446_s12   ;;  %s279_s14 = sadd.s32 4294967294, %s446_s12   ;;  %s446_s12 = sphi %s475_s12, %s646_s12   ;;  %s442_s11 = sphi %s473_s11, %s645_s11   ;;  %s438_s10 = sphi %s471_s10, %s644_s10   ;;  %s434_s9 = sphi %s469_s9, %s643_s9  }
   0x6   : > { %s494_s15 = sadd.s32 1, %s446_s12   ;;  %s25_s16 = sadd.s32 1, %s442_s11 }
   0x7   : > { %s22_s17 = ssub.s32 %s446_s12, %s494_s15  ;;  %p32_p0 = scmp.ne.s32.totalorder %s442_s11, %s438_s10 }
   0x8   : > { %p23_p1 = scmp.eq.s32.totalorder %s22_s17, 0  ;;  %p33_p2 = scmp.eq.s32.totalorder %s446_s12, 0 }
   0x9   : > { %p38_p3 = scmp.ne.s32.totalorder %s438_s10, %s434_s9  ;;  %p39_p4 = scmp.eq.s32.totalorder %s490_s13, 0 }
   0xa   : > { %s506_s18 = scalar_select %p23_p1, %s442_s11, %s25_s16  }
   0xb   : > { %p508_p5 = por %p33_p2, %p32_p0  ;;  %p512_p6 = por %p39_p4, %p38_p3 }
   0xc   : > { %p83_p7 = scmp.eq.s32.totalorder %s490_s13, 3  ;;  %p89_p8 = scmp.eq.s32.totalorder %s279_s14, 3 }
   0xd   : > { %p308_p9 = scmp.lt.s32.totalorder %s446_s12, 4  ;;  %s112_s23 = sand.u32 1, %s442_s11  }
   0xe   : > { %p518_p10 = por %p83_p7, %p32_p0  ;;  %p522_p11 = por %p89_p8, %p38_p3 }
   0xf   : > { %s294_s24 = sshll.u32 %s446_s12, 8  ;;  %s282_s25 = sshll.u32 %s112_s23, 4 }
  0x10   : > { %s638_s21 = scalar_select %p518_p10, 1, 0 }
  0x11   : > { %s639_s22 = scalar_select %p522_p11, 1, 0 }
  0x12   : > { %s531_s28 = scalar_lea.hbm %s632_s0, %s294_s24  ;;  %s116_s29 = scalar_lea.vmem [#allocation2], %s282_s25 }
  0x13   : > { %s123_s30 = sshll.u32 %s116_s29, 4  ;;  %p535_p12 = pnand %p308_p9, %p508_p5  ;;  %s539_s30 = int_to_ptr.vmem [resolvable:$true] %s123_s30 }
  0x14   : > { %s541_s4 = scalar_lea.sflag [#allocation3], %s112_s23  ;;  %s350_s5 = scalar_lea.hbm %s531_s28, 256 }
  0x15   : > { %p351_p13 = scmp.ne.s32.totalorder %s531_s28, %s350_s5  ;;  %p352_p0 = pneg %p535_p12 }
  0x16   : > { %s355_s8 = scalar_lea.hbm %s632_s0, 1024  ;;  %p356_p3 = scmp.lt.u32.totalorder %s531_s28, %s632_s0 }
  0x17   : > { %p353_p1 = pnand %p352_p0, %p351_p13  ;;  %p357_p4 = scmp.lt.u32.totalorder %s355_s8, %s350_s5 }
  0x18   : > { %p359_p7 = scmp.lt.u32.totalorder %s350_s5, %s531_s28 }
  0x19   : > { %p354_p2 = pneg %p353_p1  ;;  %p358_p5 = por %p357_p4, %p356_p3 }
  0x1b   : > { %p360_p8 = por %p359_p7, %p358_p5 }
  0x1d   : > { %p361_p9 = pnand %p360_p8, %p354_p2 }
  0x1f   : > { %364 = shalt.err (!%p361_p9)
}
  0x20   : > { %s365_s17 = scalar_lea.vmem %s539_s30, 256  ;;  %s448_s19 = smov [#allocation2]  }
  0x21   : > { %p366_p13 = scmp.ne.s32.totalorder %s539_s30, %s365_s17  ;;  %s370_s23 = sshll.u32 %s448_s19, 4  ;;  %s371_s23 = int_to_ptr.vmem [resolvable:$false] %s370_s23 }
  0x22   : > { %s372_s24 = scalar_lea.vmem %s371_s23, 512  ;;  %p373_p10 = scmp.lt.s32.totalorder %s539_s30, %s371_s23 }
  0x23   : > { %p368_p1 = pnand %p366_p13, %p352_p0  ;;  %p374_p3 = scmp.lt.s32.totalorder %s372_s24, %s365_s17 }
  0x25   : > { %p369_p11 = pneg %p368_p1  ;;  %p375_p4 = por %p374_p3, %p373_p10 }
  0x27   : > { %p376_p5 = pnand %p375_p4, %p369_p11 }
  0x29   : > { %379 = shalt.err (!%p376_p5)
}
  0x2a   : > { %s449_s25 = smov 128   ;;  %s450_s26 = smov 8  }
  0x2b   : > { %303 = dma.hbm_to_vmem [thread:$0]  (!%p535_p12), %s531_s28, 256, %s539_s30, %s541_s4, %s449_s25, %s449_s25, %s450_s26  }
  0x2c   : > { %p285_p0 = scmp.ge.s32.totalorder %s446_s12, 1  ;;  %p131_p2 = scmp.lt.s32.totalorder %s446_s12, 5 }
  0x2e   : > { %p132_p7 = pnand %p285_p0, %p131_p2 }
  0x2f   : > { %s572_s27 = sand.u32 (!%p132_p7), 1, %s438_s10  }
  0x30   : > { %135 = sbr.rel (%p132_p7) target bundleno = 239 (0xef), region = 28  ;;  %s286_s29 = sshll.u32 (!%p132_p7), %s572_s27, 4 }
  0x31   : > { %s138_s5 = scalar_lea.sflag (!%p132_p7), [#allocation3], %s572_s27  ;;  %s141_s6 = scalar_lea.vmem (!%p132_p7), [#allocation2], %s286_s29 }
  0x37   : > { %425 = dma.done.wait (%p512_p6), %s138_s5, 256  }
  0x38   : > { %427 = vsyncadd (%p512_p6), %s138_s5, 4294967040  ;;  %v164_v0 = vld [vmem:[%s141_s6] sm:$0xff]  ;;  %v165_v1 = vld [vmem:[%s141_s6 + $0x8] sm:$0xff]  ;;  %s295_s30 = sshll.u32 %s490_s13, 8  ;;  %s161_s3 = scalar_lea.vmem [#allocation5], %s286_s29 }
  0x39   : > { %v166_v2 = vmul.f32 %v164_v0, %v164_v0  ;;  %v167_v3 = vmul.f32 %v165_v1, %v165_v1  ;;  %v288_v11 = vld [vmem:[%s633_s1] ss:$0 sm:$0xff]  ;;  %s206_s4 = sshll.u32 %s161_s3, 4  ;;  %s587_s14 = scalar_lea.hbm %s634_s2, %s295_s30  ;;  %s589_s4 = int_to_ptr.vmem [resolvable:$true] %s206_s4 }
  0x3a   : > { %s193_s16 = scalar_lea.sflag [#allocation4], %s572_s27  ;;  %s380_s17 = scalar_lea.vmem %s589_s4, 256 }
  0x3b   : > { %168 = vadd.xlane.f32.xlu0 %v166_v2  ;;  %p381_p6 = scmp.ne.s32.totalorder %s589_s4, %s380_s17  ;;  %p641_p10 = scmp.ne.s32.totalorder %s638_s21, 0 }
  0x3c   : > { %s451_s13 = smov [#allocation5]  }
  0x3d   : > { %p382_p11 = pnand %p381_p6, %p641_p10  ;;  %s384_s19 = sshll.u32 %s451_s13, 4  ;;  %s385_s19 = int_to_ptr.vmem [resolvable:$false] %s384_s19 }
  0x3e   : > { %s386_s23 = scalar_lea.vmem %s385_s19, 512  ;;  %p387_p8 = scmp.lt.s32.totalorder %s589_s4, %s385_s19 }
  0x3f   : > { %170 = vadd.xlane.f32.xlu0 %v167_v3  ;;  %p383_p12 = pneg %p382_p11  ;;  %p388_p9 = scmp.lt.s32.totalorder %s386_s23, %s380_s17 }
  0x41   : > { %p389_p13 = por %p388_p9, %p387_p8 }
  0x43   : > { %p390_p1 = pnand %p389_p13, %p383_p12 }
  0xc8   : > { %v169_v4 = vpop.xlane.xlu0 %168 }
  0xc9   : > { %v173_v5 = vmul.f32 0.0078125, %v169_v4 }
  0xcb   : > { %v175_v6 = vadd.f32 1e-06, %v173_v5 }
  0xcc   : > { %v171_v7 = vpop.xlane.xlu0 %170 }
  0xcd   : > { %346 = vrsqrt.f32 %v175_v6  ;;  %v174_v8 = vmul.f32 0.0078125, %v171_v7 }
  0xcf   : > { %v176_v9 = vadd.f32 1e-06, %v174_v8 }
  0xd1   : > { %348 = vrsqrt.f32 %v176_v9 }
  0xd7   : > { %v347_v10 = vpop.eup %346 }
  0xd8   : > { %v179_v12 = vmul.f32 %v347_v10, %v164_v0 }
  0xda   : > { %v188_v13 = vmul.f32 %v288_v11, %v179_v12 }
  0xdb   : > { %v349_v14 = vpop.eup %348 }
  0xdc   : > { %v180_v15 = vmul.f32 %v349_v14, %v165_v1  ;;  %190 = vst [vmem:[%s161_s3] sm:$0xff] %v188_v13 }
  0xde   : > { %v189_v16 = vmul.f32 %v288_v11, %v180_v15 }
  0xe0   : > { %191 = vst [vmem:[%s161_s3 + $0x8] sm:$0xff] %v189_v16 }
  0xe1   : > { %393 = shalt.err (!%p390_p1)
}
  0xe2   : > { %s394_s24 = scalar_lea.hbm %s587_s14, 256  ;;  %s398_s29 = scalar_lea.hbm %s634_s2, 1024 }
  0xe3   : > { %p395_p3 = scmp.ne.s32.totalorder %s587_s14, %s394_s24  ;;  %p399_p0 = scmp.lt.u32.totalorder %s587_s14, %s634_s2 }
  0xe4   : > { %p400_p2 = scmp.lt.u32.totalorder %s398_s29, %s394_s24  ;;  %p402_p6 = scmp.lt.u32.totalorder %s394_s24, %s587_s14 }
  0xe5   : > { %p396_p4 = pnand %p395_p3, %p641_p10 }
  0xe6   : > { %p401_p7 = por %p400_p2, %p399_p0 }
  0xe7   : > { %p397_p5 = pneg %p396_p4 }
  0xe8   : > { %p403_p11 = por %p402_p6, %p401_p7 }
  0xea   : > { %p404_p12 = pnand %p403_p11, %p397_p5 }
  0xec   : > { %407 = shalt.err (!%p404_p12)
}
  0xed   : > { %s452_s28 = smov 128   ;;  %s453_s20 = smov 8  }
  0xee   : > { %298 = dma.vmem_to_hbm [thread:$0]  (%p641_p10), %s589_s4, 256, %s587_s14, %s193_s16, %s452_s28, %s452_s28, %s453_s20  }
  0xef PF: > { %p309_p8 = scmp.ge.s32.totalorder %s446_s12, 2  ;;  %s221_s30 = sand.u32 1, %s434_s9  }
  0xf0   : > { %p642_p9 = scmp.ne.s32.totalorder %s639_s22, 0  ;;  %s222_s3 = scalar_lea.sflag [#allocation4], %s221_s30 }
  0xf2   : > { %p305_p13 = pnand %p309_p8, %p642_p9 }
  0xf4   : > { %429 = dma.done.wait (!%p305_p13), %s222_s3, 256  }
  0xf5   : > { %431 = vsyncadd (!%p305_p13), %s222_s3, 4294967040  ;;  %p15_p1 = scmp.ge.s32.totalorder %s494_s15, 6   ;;  %s643_s9 = smov %s438_s10 }
  0xf6   : > { %s644_s10 = smov %s442_s11  ;;  %s645_s11 = smov %s506_s18 }
  0xf7   : > { %s646_s12 = smov %s494_s15  ;;  %17 = sbr.rel (!%p15_p1) target bundleno = 5 (0x5), region = 73 }
  0xfe   :  { %227 = vsyncpa [#allocation3], 1 }
  0xff   :  { %229 = vsyncpa [#allocation3 + $0x1], 1 }
 0x100   :  { %230 = vsyncpa [#allocation4], 1 }
 0x101   :  { %232 = vsyncpa [#allocation4 + $0x1], 1 }

</bundles_post_ra>
